<compile_context>
chip_gen: v5e
topology: v5e:2x2
jax: 0.10.0
libtpu: 0.0.40
codegen_flags: <defaults>
</compile_context>

<pallas_src>
import jax
import jax.numpy as jnp
from jax.experimental import pallas as pl
from jax.experimental.pallas import tpu as pltpu


def _round_up(x, m):
    return (x + m - 1) // m * m


def _lane(d):
    return _round_up(d, 128)


def mlp_feature_kernel(x_ref, w1_ref, b1_ref, w2_ref, b2_ref, o_ref, acc_ref):
    """One (batch-tile, hidden-chunk) step of Linear->LeakyReLU(0.1)->Dropout(0)->Linear."""
    k = pl.program_id(1)

    @pl.when(k == 0)
    def _():
        acc_ref[...] = jnp.zeros_like(acc_ref)

    # Layer 1 on this hidden chunk (f32 accumulation on the MXU).
    h = jnp.dot(x_ref[...], w1_ref[...], preferred_element_type=jnp.float32)
    h = h + b1_ref[...]                     # bias add in f32
    h = jnp.where(h > 0, h, 0.1 * h)        # LeakyReLU(negative_slope=0.1)
    # Dropout(p=0) is the identity -> no-op.

    # Layer 2 partial product over this hidden chunk; accumulate in f32.
    acc_ref[...] += jnp.dot(h.astype(w2_ref.dtype), w2_ref[...],
                            preferred_element_type=jnp.float32)

    @pl.when(k == pl.num_programs(1) - 1)
    def _():
        o_ref[...] = (acc_ref[...] + b2_ref[...]).astype(o_ref.dtype)


def _vmem_budget_bytes():
    """Per-generation VMEM budget (physical capacity with ~25% headroom)."""
    try:
        cap = pltpu.get_tpu_info().vmem_capacity_bytes
    except Exception:
        cap = 64 << 20  # conservative fallback: v7x has the smallest per-core VMEM
    return int(cap * 0.75)


def _vmem_est(tm, in_dim, th, out_p, elt_c, elt_o, xo_buf, w_buf):
    """Rough VMEM footprint (bytes) incl. lane/sublane padding of small dims."""
    return (xo_buf * tm * _lane(in_dim) * elt_c                 # x tiles
            + xo_buf * tm * _lane(out_p) * elt_o                # out tiles
            + w_buf * _round_up(in_dim, 8) * _lane(th) * elt_c  # W1 chunk(s)
            + w_buf * 8 * _lane(th) * 4                         # b1 (1 row -> 8 sublanes)
            + w_buf * _round_up(th, 8) * _lane(out_p) * elt_c   # W2 chunk(s)
            + 8 * _lane(out_p) * 4                              # b2
            + tm * _lane(out_p) * 4                             # f32 accumulator scratch
            + tm * _lane(th) * 4)                               # f32 hidden chunk (live/spill)


def _pick_tm(B8, fits):
    """Largest MXU-friendly batch tile with minimal padding waste that fits VMEM."""
    if B8 <= 128:
        return B8
    cands = [c for c in (512, 256, 128) if fits(c)] or [128]
    waste = {c: _round_up(B8, c) - B8 for c in cands}
    wmin = min(waste.values())
    best = [c for c in cands if waste[c] == wmin]
    # Among minimal-waste choices, prefer >= 2 grid steps (v7x dual-TensorCore sharding).
    multi = [c for c in best if _round_up(B8, c) // c >= 2]
    return max(multi or best)


def mlp_feature(x, w1, b1, w2, b2, *, compute_dtype=None):
    """Fused 2-layer MLP (layers=2). Weights are (fan_in, fan_out); biases (dim,) / (1, dim).

    compute_dtype: dtype of the MXU operands (x / W1 / W2). Defaults to x.dtype; pass
    jnp.bfloat16 for much higher MXU throughput and half the DMA bytes (results then
    diverge from an f32 reference at the ~1e-2 level). Accumulation, bias adds and
    LeakyReLU always stay f32.
    """
    # TODO(synk): MLPFeature with layers != 2 stacks more hidden layers; chain this
    # kernel (or add more hidden stages) for that case.
    B, in_dim = x.shape
    in_w1, hid_dim = w1.shape
    hid_w2, out_dim = w2.shape
    assert in_w1 == in_dim and hid_w2 == hid_dim

    out_dtype = x.dtype
    cdt = jnp.dtype(compute_dtype) if compute_dtype is not None else jnp.dtype(x.dtype)
    elt_c = cdt.itemsize
    elt_o = jnp.dtype(out_dtype).itemsize

    # Output lane padding only when the extra HBM writeback is small (<= 12.5%);
    # otherwise keep the full-extent (possibly masked-store) width.
    out_p = out_dim
    if out_dim % 128 != 0:
        padded = _round_up(out_dim, 128)
        if padded - out_dim <= out_dim // 8:
            out_p = padded

    budget = _vmem_budget_bytes()
    B8 = _round_up(B, 8)
    tm_probe = min(B8, 128)
    xo_buf_probe = 1 if B8 <= 128 else 2

    # Hidden-dim blocking: keep the whole hidden dim resident when it fits, otherwise
    # the largest 128-multiple chunk that does.
    if _vmem_est(tm_probe, in_dim, hid_dim, out_p, elt_c, elt_o, xo_buf_probe, 1) <= budget:
        th, kt = hid_dim, 1
    else:
        th = 128
        for cand in (4096, 2048, 1024, 512, 256, 128):
            if cand < hid_dim and _vmem_est(tm_probe, in_dim, cand, out_p, elt_c, elt_o,
                                            xo_buf_probe, 2) <= budget:
                th = cand
                break
        kt = pl.cdiv(hid_dim, th)
    hid_p = kt * th
    w_buf = 1 if kt == 1 else 2

    def fits(tm):
        xo = 2 if _round_up(B8, tm) // tm > 1 else 1
        return _vmem_est(tm, in_dim, th, out_p, elt_c, elt_o, xo, w_buf) <= budget

    tm = _pick_tm(B8, fits)
    B_p = _round_up(B8, tm)
    bt = B_p // tm
    xo_buf = 2 if bt > 1 else 1

    # --- Operand prep. In the common (kt == 1, out_p == out_dim) case nothing below
    # pads, so the only possible per-call pad is a row pad of x.
    # TODO(synk): for the hidden-blocked / out-padded cases, pre-pad & cache the padded
    # weight copies at parameter-creation time instead of per call.
    b1 = jnp.asarray(b1, jnp.float32).reshape(1, -1)
    b2 = jnp.asarray(b2, jnp.float32).reshape(1, -1)

    xp = x.astype(cdt)
    if B_p != B:
        xp = jnp.pad(xp, ((0, B_p - B), (0, 0)))
    w1p = w1.astype(cdt)
    w2p = w2.astype(cdt)
    b1p, b2p = b1, b2
    if hid_p != hid_dim:
        # Exact: padded b1 cols = 0 -> LeakyReLU(0) = 0, padded W2 rows = 0.
        w1p = jnp.pad(w1p, ((0, 0), (0, hid_p - hid_dim)))
        b1p = jnp.pad(b1p, ((0, 0), (0, hid_p - hid_dim)))
        w2p = jnp.pad(w2p, ((0, hid_p - hid_dim), (0, 0)))
    if out_p != out_dim:
        w2p = jnp.pad(w2p, ((0, 0), (0, out_p - out_dim)))
        b2p = jnp.pad(b2p, ((0, 0), (0, out_p - out_dim)))

    cost = pl.CostEstimate(
        flops=2 * B_p * (in_dim * hid_p + hid_p * out_p),
        transcendentals=0,
        bytes_accessed=(B_p * in_dim + in_dim * hid_p + hid_p * out_p) * elt_c
        + (hid_p + out_p) * 4
        + B_p * out_p * elt_o,
    )

    vmem_est = _vmem_est(tm, in_dim, th, out_p, elt_c, elt_o, xo_buf, w_buf)
    # Raise the scoped limit whenever we might exceed the smallest per-generation
    # default (v5e: 16 MiB); cap at the generation's physical budget.
    vmem_limit = None
    if vmem_est > (12 << 20):
        vmem_limit = int(min(budget, max(int(vmem_est * 1.5), 32 << 20)))

    def run(use_single_buffer):
        def spec(shape, imap, bufs):
            if use_single_buffer and bufs == 1:
                return pl.BlockSpec(shape, imap, pipeline_mode=pl.Buffered(1))
            return pl.BlockSpec(shape, imap)

        return pl.pallas_call(
            mlp_feature_kernel,
            out_shape=jax.ShapeDtypeStruct((B_p, out_p), out_dtype),
            grid_spec=pltpu.PrefetchScalarGridSpec(
                num_scalar_prefetch=0,
                grid=(bt, kt),
                in_specs=[
                    spec((tm, in_dim), lambda i, k: (i, 0), xo_buf),  # x tile
                    spec((in_dim, th), lambda i, k: (0, k), w_buf),   # W1 column chunk
                    spec((1, th), lambda i, k: (0, k), w_buf),        # b1 chunk
                    spec((th, out_p), lambda i, k: (k, 0), w_buf),    # W2 row chunk
                    spec((1, out_p), lambda i, k: (0, 0), 1),         # b2 (constant)
                ],
                out_specs=spec((tm, out_p), lambda i, k: (i, 0), xo_buf),
                scratch_shapes=[pltpu.VMEM((tm, out_p), jnp.float32)],
            ),
            compiler_params=pltpu.CompilerParams(
                dimension_semantics=("parallel", "arbitrary"),
                vmem_limit_bytes=vmem_limit,
            ),
            cost_estimate=cost,
        )(xp, w1p, b1p, w2p, b2p)

    try:
        out_padded = run(True)
    except Exception:
        # jax build without BlockSpec.pipeline_mode / Buffered(1) support on the grid
        # pipeline: fall back to default double-buffering (correctness identical).
        out_padded = run(False)

    if B_p != B or out_p != out_dim:
        out_padded = out_padded[:B, :out_dim]
    return out_padded


def init_linear(key, fan_in, fan_out, dtype=jnp.float32):
    """torch.nn.Linear-style init: U(-1/sqrt(fan_in), 1/sqrt(fan_in)).
    Weight returned pre-transposed as (fan_in, fan_out); bias as (1, fan_out)."""
    kw, kb = jax.random.split(key)
    bound = 1.0 / jnp.sqrt(jnp.asarray(fan_in, dtype))
    w = jax.random.uniform(kw, (fan_in, fan_out), dtype, -bound, bound)
    b = jax.random.uniform(kb, (1, fan_out), dtype, -bound, bound)
    return w, b


def mlp_feature_ref(x, w1, b1, w2, b2):
    h = x @ w1 + b1
    h = jnp.where(h > 0, h, 0.1 * h)
    return h @ w2 + b2


if __name__ == "__main__":
    key = jax.random.PRNGKey(0)
    k_x, k_l1, k_l2 = jax.random.split(key, 3)

    # Small shapes consistent with MLPFeature(in_dim=32, hid_dim=64, out_dim=16, layers=2)
    batch, in_dim, hid_dim, out_dim = 16, 32, 64, 16

    x = jax.random.normal(k_x, (batch, in_dim), jnp.float32)
    w1, b1 = init_linear(k_l1, in_dim, hid_dim)
    w2, b2 = init_linear(k_l2, hid_dim, out_dim)

    ref = mlp_feature_ref(x, w1, b1, w2, b2)

    # f32 MXU operands: matches the float32 PyTorch reference.
    out = jax.block_until_ready(mlp_feature(x, w1, b1, w2, b2))
    assert out.shape == (batch, out_dim)
    assert jnp.allclose(out, ref, atol=1e-5, rtol=1e-5), "f32 mismatch vs reference"

    # bf16 MXU operands (f32 accumulation / bias / LeakyReLU): fast path, looser tolerance.
    out_bf16 = jax.block_until_ready(
        mlp_feature(x, w1, b1, w2, b2, compute_dtype=jnp.bfloat16))
    assert out_bf16.shape == (batch, out_dim)
    assert jnp.allclose(out_bf16, ref, atol=5e-2, rtol=5e-2), "bf16 mismatch vs reference"

    print("KERNEL_OK")
</pallas_src>

<mosaic_0001>
module attributes {stable_mosaic.version = 11 : i64} {
  func.func @mlp_feature_kernel(%arg0: i32, %arg1: i32, %arg2: memref<16x32xf32, #tpu.memory_space<vmem>>, %arg3: memref<32x64xf32, #tpu.memory_space<vmem>>, %arg4: memref<1x64xf32, #tpu.memory_space<vmem>>, %arg5: memref<64x16xf32, #tpu.memory_space<vmem>>, %arg6: memref<1x16xf32, #tpu.memory_space<vmem>>, %arg7: memref<16x16xf32, #tpu.memory_space<vmem>>, %arg8: memref<16x16xf32, #tpu.memory_space<vmem>>) attributes {dimension_semantics = [#tpu.dimension_semantics<parallel>, #tpu.dimension_semantics<arbitrary>], iteration_bounds = array<i64: 1, 1>, scalar_prefetch = 0 : i64, scratch_operands = 1 : i64, tpu.core_type = #tpu.core_type<tc>, window_params = [{pipeline_mode = #tpu.pipeline_mode<synchronous>, transform_indices = @transform_0, window_bounds = array<i64: 16, 32>}, {pipeline_mode = #tpu.pipeline_mode<synchronous>, transform_indices = @transform_1, window_bounds = array<i64: 32, 64>}, {pipeline_mode = #tpu.pipeline_mode<synchronous>, transform_indices = @transform_2, window_bounds = array<i64: 1, 64>}, {pipeline_mode = #tpu.pipeline_mode<synchronous>, transform_indices = @transform_3, window_bounds = array<i64: 64, 16>}, {pipeline_mode = #tpu.pipeline_mode<synchronous>, transform_indices = @transform_4, window_bounds = array<i64: 1, 16>}, {pipeline_mode = #tpu.pipeline_mode<synchronous>, transform_indices = @transform_5, window_bounds = array<i64: 16, 16>}]} {
    %c0_i32 = arith.constant 0 : i32
    %0 = arith.cmpi eq, %arg1, %c0_i32 : i32
    %1 = arith.extui %0 : i1 to i32
    %c0_i32_0 = arith.constant 0 : i32
    %2 = arith.cmpi ne, %1, %c0_i32_0 : i32
    scf.if %2 {
      %cst_17 = arith.constant 0.000000e+00 : f32
      %22 = vector.broadcast %cst_17 : f32 to vector<16x16xf32>
      %c0_18 = arith.constant 0 : index
      %c0_19 = arith.constant 0 : index
      %23 = vector.load %arg8[%c0_18, %c0_19] : memref<16x16xf32, #tpu.memory_space<vmem>>, vector<16x16xf32>
      tpu.vector_store %arg8[%c0_18, %c0_19], %22 {strides = array<i32>} : memref<16x16xf32, #tpu.memory_space<vmem>>, vector<16x16xf32>,
    } else {
    }
    %c0 = arith.constant 0 : index
    %c0_1 = arith.constant 0 : index
    %3 = vector.load %arg2[%c0, %c0_1] : memref<16x32xf32, #tpu.memory_space<vmem>>, vector<16x32xf32>
    %c0_2 = arith.constant 0 : index
    %c0_3 = arith.constant 0 : index
    %4 = vector.load %arg3[%c0_2, %c0_3] : memref<32x64xf32, #tpu.memory_space<vmem>>, vector<32x64xf32>
    %cst = arith.constant dense<0.000000e+00> : vector<16x64xf32>
    %5 = tpu.matmul %3, %4, %cst {dimension_numbers = #tpu.dot_dimension_numbers<[1], [0], [0], [1], [0, 0, 1, 1], [], []>} : vector<16x32xf32>, vector<32x64xf32>, vector<16x64xf32> -> vector<16x64xf32>
    %c0_4 = arith.constant 0 : index
    %c0_5 = arith.constant 0 : index
    %6 = vector.load %arg4[%c0_4, %c0_5] : memref<1x64xf32, #tpu.memory_space<vmem>>, vector<1x64xf32>
    %7 = vector.broadcast %6 : vector<1x64xf32> to vector<16x64xf32>
    %8 = arith.addf %5, %7 : vector<16x64xf32>
    %cst_6 = arith.constant 0.000000e+00 : f32
    %9 = vector.broadcast %cst_6 : f32 to vector<16x64xf32>
    %10 = arith.cmpf ogt, %8, %9 : vector<16x64xf32>
    %cst_7 = arith.constant 1.000000e-01 : f32
    %11 = vector.broadcast %cst_7 : f32 to vector<16x64xf32>
    %12 = arith.mulf %11, %8 : vector<16x64xf32>
    %13 = arith.select %10, %8, %12 : vector<16x64xi1>, vector<16x64xf32>
    %c0_8 = arith.constant 0 : index
    %c0_9 = arith.constant 0 : index
    %14 = vector.load %arg8[%c0_8, %c0_9] : memref<16x16xf32, #tpu.memory_space<vmem>>, vector<16x16xf32>
    %c0_10 = arith.constant 0 : index
    %c0_11 = arith.constant 0 : index
    %15 = vector.load %arg5[%c0_10, %c0_11] : memref<64x16xf32, #tpu.memory_space<vmem>>, vector<64x16xf32>
    %cst_12 = arith.constant dense<0.000000e+00> : vector<16x16xf32>
    %16 = tpu.matmul %13, %15, %cst_12 {dimension_numbers = #tpu.dot_dimension_numbers<[1], [0], [0], [1], [0, 0, 1, 1], [], []>} : vector<16x64xf32>, vector<64x16xf32>, vector<16x16xf32> -> vector<16x16xf32>
    %17 = arith.addf %14, %16 : vector<16x16xf32>
    %c0_13 = arith.constant 0 : index
    %c0_14 = arith.constant 0 : index
    %18 = vector.load %arg8[%c0_13, %c0_14] : memref<16x16xf32, #tpu.memory_space<vmem>>, vector<16x16xf32>
    tpu.vector_store %arg8[%c0_13, %c0_14], %17 {strides = array<i32>} : memref<16x16xf32, #tpu.memory_space<vmem>>, vector<16x16xf32>,
    %c0_i32_15 = arith.constant 0 : i32
    %19 = arith.cmpi eq, %arg1, %c0_i32_15 : i32
    %20 = arith.extui %19 : i1 to i32
    %c0_i32_16 = arith.constant 0 : i32
    %21 = arith.cmpi ne, %20, %c0_i32_16 : i32
    scf.if %21 {
      %c0_17 = arith.constant 0 : index
      %c0_18 = arith.constant 0 : index
      %22 = vector.load %arg8[%c0_17, %c0_18] : memref<16x16xf32, #tpu.memory_space<vmem>>, vector<16x16xf32>
      %c0_19 = arith.constant 0 : index
      %c0_20 = arith.constant 0 : index
      %23 = vector.load %arg6[%c0_19, %c0_20] : memref<1x16xf32, #tpu.memory_space<vmem>>, vector<1x16xf32>
      %24 = vector.broadcast %23 : vector<1x16xf32> to vector<16x16xf32>
      %25 = arith.addf %22, %24 : vector<16x16xf32>
      %c0_21 = arith.constant 0 : index
      %c0_22 = arith.constant 0 : index
      %26 = vector.load %arg7[%c0_21, %c0_22] : memref<16x16xf32, #tpu.memory_space<vmem>>, vector<16x16xf32>
      tpu.vector_store %arg7[%c0_21, %c0_22], %25 {strides = array<i32>} : memref<16x16xf32, #tpu.memory_space<vmem>>, vector<16x16xf32>,
    } else {
    }
    return
  }
  func.func @transform_0(%arg0: i32, %arg1: i32) -> (i32, i32) {
    %c0_i32 = arith.constant 0 : i32
    %c0_i32_0 = arith.constant 0 : i32
    return %arg0, %c0_i32 : i32, i32
  }
  func.func @transform_1(%arg0: i32, %arg1: i32) -> (i32, i32) {
    %c0_i32 = arith.constant 0 : i32
    %c0_i32_0 = arith.constant 0 : i32
    return %c0_i32, %arg1 : i32, i32
  }
  func.func @transform_2(%arg0: i32, %arg1: i32) -> (i32, i32) {
    %c0_i32 = arith.constant 0 : i32
    %c0_i32_0 = arith.constant 0 : i32
    return %c0_i32, %arg1 : i32, i32
  }
  func.func @transform_3(%arg0: i32, %arg1: i32) -> (i32, i32) {
    %c0_i32 = arith.constant 0 : i32
    %c0_i32_0 = arith.constant 0 : i32
    return %arg1, %c0_i32 : i32, i32
  }
  func.func @transform_4(%arg0: i32, %arg1: i32) -> (i32, i32) {
    %c0_i32 = arith.constant 0 : i32
    %c0_i32_0 = arith.constant 0 : i32
    %c0_i32_1 = arith.constant 0 : i32
    return %c0_i32, %c0_i32_0 : i32, i32
  }
  func.func @transform_5(%arg0: i32, %arg1: i32) -> (i32, i32) {
    %c0_i32 = arith.constant 0 : i32
    %c0_i32_0 = arith.constant 0 : i32
    return %arg0, %c0_i32 : i32, i32
  }
}

module attributes {stable_mosaic.version = 11 : i64} {
  func.func @mlp_feature_kernel(%arg0: i32, %arg1: i32, %arg2: memref<16x32xf32, #tpu.memory_space<vmem>>, %arg3: memref<32x64xf32, #tpu.memory_space<vmem>>, %arg4: memref<1x64xf32, #tpu.memory_space<vmem>>, %arg5: memref<64x16xf32, #tpu.memory_space<vmem>>, %arg6: memref<1x16xf32, #tpu.memory_space<vmem>>, %arg7: memref<16x16xf32, #tpu.memory_space<vmem>>, %arg8: memref<16x16xf32, #tpu.memory_space<vmem>>) attributes {dimension_semantics = [#tpu.dimension_semantics<parallel>, #tpu.dimension_semantics<arbitrary>], iteration_bounds = array<i64: 1, 1>, scalar_prefetch = 0 : i64, scratch_operands = 1 : i64, tpu.core_type = #tpu.core_type<tc>, window_params = [{transform_indices = @transform_0, window_bounds = array<i64: 16, 32>}, {transform_indices = @transform_1, window_bounds = array<i64: 32, 64>}, {transform_indices = @transform_2, window_bounds = array<i64: 1, 64>}, {transform_indices = @transform_3, window_bounds = array<i64: 64, 16>}, {pipeline_mode = #tpu.pipeline_mode<synchronous>, transform_indices = @transform_4, window_bounds = array<i64: 1, 16>}, {transform_indices = @transform_5, window_bounds = array<i64: 16, 16>}]} {
    %c0_i32 = arith.constant 0 : i32
    %0 = arith.cmpi eq, %arg1, %c0_i32 : i32
    %1 = arith.extui %0 : i1 to i32
    %c0_i32_0 = arith.constant 0 : i32
    %2 = arith.cmpi ne, %1, %c0_i32_0 : i32
    scf.if %2 {
      %cst_17 = arith.constant 0.000000e+00 : f32
      %22 = vector.broadcast %cst_17 : f32 to vector<16x16xf32>
      %c0_18 = arith.constant 0 : index
      %c0_19 = arith.constant 0 : index
      %23 = vector.load %arg8[%c0_18, %c0_19] : memref<16x16xf32, #tpu.memory_space<vmem>>, vector<16x16xf32>
      tpu.vector_store %arg8[%c0_18, %c0_19], %22 {strides = array<i32>} : memref<16x16xf32, #tpu.memory_space<vmem>>, vector<16x16xf32>,
    } else {
    }
    %c0 = arith.constant 0 : index
    %c0_1 = arith.constant 0 : index
    %3 = vector.load %arg2[%c0, %c0_1] : memref<16x32xf32, #tpu.memory_space<vmem>>, vector<16x32xf32>
    %c0_2 = arith.constant 0 : index
    %c0_3 = arith.constant 0 : index
    %4 = vector.load %arg3[%c0_2, %c0_3] : memref<32x64xf32, #tpu.memory_space<vmem>>, vector<32x64xf32>
    %cst = arith.constant dense<0.000000e+00> : vector<16x64xf32>
    %5 = tpu.matmul %3, %4, %cst {dimension_numbers = #tpu.dot_dimension_numbers<[1], [0], [0], [1], [0, 0, 1, 1], [], []>} : vector<16x32xf32>, vector<32x64xf32>, vector<16x64xf32> -> vector<16x64xf32>
    %c0_4 = arith.constant 0 : index
    %c0_5 = arith.constant 0 : index
    %6 = vector.load %arg4[%c0_4, %c0_5] : memref<1x64xf32, #tpu.memory_space<vmem>>, vector<1x64xf32>
    %7 = vector.broadcast %6 : vector<1x64xf32> to vector<16x64xf32>
    %8 = arith.addf %5, %7 : vector<16x64xf32>
    %cst_6 = arith.constant 0.000000e+00 : f32
    %9 = vector.broadcast %cst_6 : f32 to vector<16x64xf32>
    %10 = arith.cmpf ogt, %8, %9 : vector<16x64xf32>
    %cst_7 = arith.constant 1.000000e-01 : f32
    %11 = vector.broadcast %cst_7 : f32 to vector<16x64xf32>
    %12 = arith.mulf %11, %8 : vector<16x64xf32>
    %13 = arith.select %10, %8, %12 : vector<16x64xi1>, vector<16x64xf32>
    %c0_8 = arith.constant 0 : index
    %c0_9 = arith.constant 0 : index
    %14 = vector.load %arg8[%c0_8, %c0_9] : memref<16x16xf32, #tpu.memory_space<vmem>>, vector<16x16xf32>
    %c0_10 = arith.constant 0 : index
    %c0_11 = arith.constant 0 : index
    %15 = vector.load %arg5[%c0_10, %c0_11] : memref<64x16xf32, #tpu.memory_space<vmem>>, vector<64x16xf32>
    %cst_12 = arith.constant dense<0.000000e+00> : vector<16x16xf32>
    %16 = tpu.matmul %13, %15, %cst_12 {dimension_numbers = #tpu.dot_dimension_numbers<[1], [0], [0], [1], [0, 0, 1, 1], [], []>} : vector<16x64xf32>, vector<64x16xf32>, vector<16x16xf32> -> vector<16x16xf32>
    %17 = arith.addf %14, %16 : vector<16x16xf32>
    %c0_13 = arith.constant 0 : index
    %c0_14 = arith.constant 0 : index
    %18 = vector.load %arg8[%c0_13, %c0_14] : memref<16x16xf32, #tpu.memory_space<vmem>>, vector<16x16xf32>
    tpu.vector_store %arg8[%c0_13, %c0_14], %17 {strides = array<i32>} : memref<16x16xf32, #tpu.memory_space<vmem>>, vector<16x16xf32>,
    %c0_i32_15 = arith.constant 0 : i32
    %19 = arith.cmpi eq, %arg1, %c0_i32_15 : i32
    %20 = arith.extui %19 : i1 to i32
    %c0_i32_16 = arith.constant 0 : i32
    %21 = arith.cmpi ne, %20, %c0_i32_16 : i32
    scf.if %21 {
      %c0_17 = arith.constant 0 : index
      %c0_18 = arith.constant 0 : index
      %22 = vector.load %arg8[%c0_17, %c0_18] : memref<16x16xf32, #tpu.memory_space<vmem>>, vector<16x16xf32>
      %c0_19 = arith.constant 0 : index
      %c0_20 = arith.constant 0 : index
      %23 = vector.load %arg6[%c0_19, %c0_20] : memref<1x16xf32, #tpu.memory_space<vmem>>, vector<1x16xf32>
      %24 = vector.broadcast %23 : vector<1x16xf32> to vector<16x16xf32>
      %25 = arith.addf %22, %24 : vector<16x16xf32>
      %c0_21 = arith.constant 0 : index
      %c0_22 = arith.constant 0 : index
      %26 = vector.load %arg7[%c0_21, %c0_22] : memref<16x16xf32, #tpu.memory_space<vmem>>, vector<16x16xf32>
      tpu.vector_store %arg7[%c0_21, %c0_22], %25 {strides = array<i32>} : memref<16x16xf32, #tpu.memory_space<vmem>>, vector<16x16xf32>,
    } else {
    }
    return
  }
  func.func @transform_0(%arg0: i32, %arg1: i32) -> (i32, i32) {
    %c0_i32 = arith.constant 0 : i32
    %c0_i32_0 = arith.constant 0 : i32
    return %arg0, %c0_i32 : i32, i32
  }
  func.func @transform_1(%arg0: i32, %arg1: i32) -> (i32, i32) {
    %c0_i32 = arith.constant 0 : i32
    %c0_i32_0 = arith.constant 0 : i32
    return %c0_i32, %arg1 : i32, i32
  }
  func.func @transform_2(%arg0: i32, %arg1: i32) -> (i32, i32) {
    %c0_i32 = arith.constant 0 : i32
    %c0_i32_0 = arith.constant 0 : i32
    return %c0_i32, %arg1 : i32, i32
  }
  func.func @transform_3(%arg0: i32, %arg1: i32) -> (i32, i32) {
    %c0_i32 = arith.constant 0 : i32
    %c0_i32_0 = arith.constant 0 : i32
    return %arg1, %c0_i32 : i32, i32
  }
  func.func @transform_4(%arg0: i32, %arg1: i32) -> (i32, i32) {
    %c0_i32 = arith.constant 0 : i32
    %c0_i32_0 = arith.constant 0 : i32
    %c0_i32_1 = arith.constant 0 : i32
    return %c0_i32, %c0_i32_0 : i32, i32
  }
  func.func @transform_5(%arg0: i32, %arg1: i32) -> (i32, i32) {
    %c0_i32 = arith.constant 0 : i32
    %c0_i32_0 = arith.constant 0 : i32
    return %arg0, %c0_i32 : i32, i32
  }
}

</mosaic_0001>

<bundles_post_ra>
// kernel: tpu_custom_call.1
= control target key start
LH: loop header
LB: loop body
LE: loop exit
PB: predicated region body
PF: predicated region fallthrough
CT: control target
= control target key end

     0   :  { %s289_s0 = inlined_call_operand.vmem [shape: f32[16,32], index: 0, kind: input, shape index: {}]   ;;  %s290_s1 = inlined_call_operand.vmem [shape: f32[32,64], index: 1, kind: input, shape index: {}]   ;;  %s291_s2 = inlined_call_operand.vmem [shape: f32[1,64], index: 2, kind: input, shape index: {}]   ;;  %s292_s3 = inlined_call_operand.vmem [shape: f32[64,16], index: 3, kind: input, shape index: {}]   ;;  %s293_s4 = inlined_call_operand.vmem [shape: f32[1,16], index: 4, kind: input, shape index: {}]   ;;  %s294_s5 = inlined_call_operand.hbm [shape: f32[16,16], index: 5, kind: output, shape index: {}]  }
   0x1   :  { %v33_v0 = vld [vmem:[%s290_s1 + $0x18] sm:$0xff]  ;;  %v32_v1 = vld [vmem:[%s290_s1 + $0x10] sm:$0xff]  ;;  %v31_v2 = vld [vmem:[%s290_s1 + $0x8] sm:$0xff] }
   0x2   :  { %154 = vmatpush.msra.mxu3 %v33_v0  ;;  %57 = vmatpush.msra.mxu0 %v33_v0  ;;  %v83_v3 = vld [vmem:[%s292_s3 + $0x38] sm:$0xff]  ;;  %v82_v4 = vld [vmem:[%s292_s3 + $0x30] sm:$0xff]  ;;  %v30_v5 = vld [vmem:[%s290_s1] sm:$0xff] }
   0x3   :  { %158 = vmatpush.msra.mxu2 %v83_v3  ;;  %99 = vmatpush.msra.mxu1 %v83_v3 }
   0x4   :  { %155 = vmatpush.msra.mxu3 %v32_v1  ;;  %58 = vmatpush.msra.mxu0 %v32_v1 }
   0x5   :  { %10 = vsyncpa [#allocation4], 0  ;;  %v29_v6 = vld [vmem:[%s289_s0 + $0x8] sm:$0xff]  ;;  %vm38_vm0 = vcmask 261120   ;;  %v28_v7 = vld [vmem:[%s289_s0] sm:$0xff]  ;;  %159 = vmatpush.msra.mxu2 %v82_v4  ;;  %100 = vmatpush.msra.mxu1 %v82_v4  ;;  %vm25_vm1 = vcmask 130048  }
   0x6   :  { %156 = vmatpush.msra.mxu3 %v31_v2  ;;  %59 = vmatpush.msra.mxu0 %v31_v2  ;;  %v81_v8 = vld [vmem:[%s292_s3 + $0x28] sm:$0xff]  ;;  %v80_v9 = vld [vmem:[%s292_s3 + $0x20] sm:$0xff]  ;;  %v79_v10 = vld [vmem:[%s292_s3 + $0x18] sm:$0xff]  ;;  %v198_v14 = vmov 0.0   ;;  %vm84_vm3 = vcmask 523264   ;;  %s199_s21 = smov [#allocation3]  }
   0x7   :  { %160 = vmatpush.msra.mxu2 %v81_v8  ;;  %101 = vmatpush.msra.mxu1 %v81_v8  ;;  %v78_v11 = vld [vmem:[%s292_s3 + $0x10] sm:$0xff]  ;;  %v77_v12 = vld [vmem:[%s292_s3 + $0x8] sm:$0xff]  ;;  %v76_v13 = vld [vmem:[%s292_s3] sm:$0xff]  ;;  %26 = vst.msk [vmem:[#allocation2] sm:$0xff] %vm25_vm1, %v198_v14  ;;  %s136_s22 = sshll.u32 %s199_s21, 4  ;;  %s138_s25 = sshll.u32 %s294_s5, 4  ;;  %s137_s22 = int_to_ptr.vmem [resolvable:$true] %s136_s22  ;;  %s139_s25 = int_to_ptr.hbm [resolvable:$true] %s138_s25 }
   0x8   :  { %157 = vmatpush.msra.mxu3 %v30_v5  ;;  %60 = vmatpush.msra.mxu0 %v30_v5  ;;  %27 = vst.msk [vmem:[#allocation2 + $0x8] sm:$0xff] %vm25_vm1, %v198_v14  ;;  %v170_v15 = vld [vmem:[%s291_s2] ss:$0 sm:$0xff]  ;;  %s201_s26 = smov 8  }
   0x9   :  { %151 = vmatmul.msk.f32.vlgmr.msra.gmra.mxu3 %vm38_vm0, %v29_v6  ;;  %150 = vmatmul.msk.f32.vlgmr.msra.gmra.mxu0 %vm38_vm0, %v28_v7  ;;  %v171_v27 = vld [vmem:[%s293_s4] ss:$0 sm:$0xff]  ;;  %s200_s4 = smov 128  }
   0xa   :  { %161 = vmatpush.msra.mxu2 %v80_v9  ;;  %102 = vmatpush.msra.mxu1 %v80_v9 }
   0xc   :  { %162 = vmatpush.msra.mxu2 %v79_v10  ;;  %103 = vmatpush.msra.mxu1 %v79_v10 }
   0xe   :  { %163 = vmatpush.msra.mxu2 %v78_v11  ;;  %104 = vmatpush.msra.mxu1 %v78_v11  ;;  %v74_v24 = vld [vmem:[#allocation2] sm:$0xff] }
   0xf   :  { %v75_v28 = vld [vmem:[#allocation2 + $0x8] sm:$0xff] }
  0x10   :  { %164 = vmatpush.msra.mxu2 %v77_v12  ;;  %105 = vmatpush.msra.mxu1 %v77_v12 }
  0x12   :  { %165 = vmatpush.msra.mxu2 %v76_v13  ;;  %106 = vmatpush.msra.mxu1 %v76_v13 }
  0x86   :  { %v62_v16 = vpop.f32.mrf.mxu0 }
  0x87   :  { %v63_v17 = vadd.f32 %v170_v15, %v62_v16 }
  0x89   :  { %v70_v18 = vmul.f32 0.1, %v63_v17  ;;  %vm68_vm2 = vcmp.gt.f32.partialorder %v63_v17, 0.0 }
  0x8b   :  { %v72_v19 = vsel %vm68_vm2, %v63_v17, %v70_v18 }
  0x8c   :  { %v65_v20 = vpop.f32.mrf.mxu3  ;;  %152 = vmatmul.msk.f32.vlgmr.msra.gmra.mxu1 %vm84_vm3, %v72_v19 }
  0x8d   :  { %v66_v21 = vadd.f32 %v170_v15, %v65_v20 }
  0x8f   :  { %v71_v22 = vmul.f32 0.1, %v66_v21  ;;  %vm69_vm4 = vcmp.gt.f32.partialorder %v66_v21, 0.0 }
  0x91   :  { %v73_v23 = vsel %vm69_vm4, %v66_v21, %v71_v22 }
  0x92   :  { %153 = vmatmul.msk.f32.vlgmr.msra.gmra.mxu2 %vm84_vm3, %v73_v23 }
 0x109   :  { %v108_v25 = vpop.f32.mrf.mxu1 }
 0x10a   :  { %v114_v26 = vadd.f32 %v108_v25, %v74_v24 }
 0x10c   :  { %117 = vst.msk [vmem:[#allocation2] sm:$0xff] %vm25_vm1, %v114_v26 }
 0x113   :  { %v122_v29 = vld [vmem:[#allocation2] sm:$0xff] }
 0x114   :  { %v128_v30 = vadd.f32 %v171_v27, %v122_v29 }
 0x115   :  { %v111_v31 = vpop.f32.mrf.mxu2 }
 0x116   :  { %v115_v32 = vadd.f32 %v111_v31, %v75_v28  ;;  %130 = vst.msk [vmem:[#allocation3] sm:$0xff] %vm25_vm1, %v128_v30 }
 0x118   :  { %118 = vst.msk [vmem:[#allocation2 + $0x8] sm:$0xff] %vm25_vm1, %v115_v32 }
 0x11f   :  { %v123_v33 = vld [vmem:[#allocation2 + $0x8] sm:$0xff] }
 0x120   :  { %v129_v34 = vadd.f32 %v171_v27, %v123_v33 }
 0x122   :  { %131 = vst.msk [vmem:[#allocation3 + $0x8] sm:$0xff] %vm25_vm1, %v129_v34 }
 0x123   :  { %144 = dma.vmem_to_hbm [thread:$0]  %s137_s22, 256, %s139_s25, [#allocation4], %s200_s4, %s200_s4, %s201_s26  }
 0x124   :  { %196 = dma.done.wait [#allocation4], 256  }
 0x125   :  { %197 = vsyncadd [#allocation4], 4294967040 }
 0x126   :  { %149 = vsyncpa [#allocation4], 1 }

// kernel: tpu_custom_call.1
= control target key start
LH: loop header
LB: loop body
LE: loop exit
PB: predicated region body
PF: predicated region fallthrough
CT: control target
= control target key end

     0   :  { %s289_s0 = inlined_call_operand.vmem [shape: f32[16,32], index: 0, kind: input, shape index: {}]   ;;  %s290_s1 = inlined_call_operand.vmem [shape: f32[32,64], index: 1, kind: input, shape index: {}]   ;;  %s291_s2 = inlined_call_operand.vmem [shape: f32[1,64], index: 2, kind: input, shape index: {}]   ;;  %s292_s3 = inlined_call_operand.vmem [shape: f32[64,16], index: 3, kind: input, shape index: {}]   ;;  %s293_s4 = inlined_call_operand.vmem [shape: f32[1,16], index: 4, kind: input, shape index: {}]   ;;  %s294_s5 = inlined_call_operand.hbm [shape: f32[16,16], index: 5, kind: output, shape index: {}]  }
   0x1   :  { %v33_v0 = vld [vmem:[%s290_s1 + $0x18] sm:$0xff]  ;;  %v32_v1 = vld [vmem:[%s290_s1 + $0x10] sm:$0xff]  ;;  %v31_v2 = vld [vmem:[%s290_s1 + $0x8] sm:$0xff] }
   0x2   :  { %154 = vmatpush.msra.mxu3 %v33_v0  ;;  %57 = vmatpush.msra.mxu0 %v33_v0  ;;  %v83_v3 = vld [vmem:[%s292_s3 + $0x38] sm:$0xff]  ;;  %v82_v4 = vld [vmem:[%s292_s3 + $0x30] sm:$0xff]  ;;  %v30_v5 = vld [vmem:[%s290_s1] sm:$0xff] }
   0x3   :  { %158 = vmatpush.msra.mxu2 %v83_v3  ;;  %99 = vmatpush.msra.mxu1 %v83_v3 }
   0x4   :  { %155 = vmatpush.msra.mxu3 %v32_v1  ;;  %58 = vmatpush.msra.mxu0 %v32_v1 }
   0x5   :  { %10 = vsyncpa [#allocation4], 0  ;;  %v29_v6 = vld [vmem:[%s289_s0 + $0x8] sm:$0xff]  ;;  %vm38_vm0 = vcmask 261120   ;;  %v28_v7 = vld [vmem:[%s289_s0] sm:$0xff]  ;;  %159 = vmatpush.msra.mxu2 %v82_v4  ;;  %100 = vmatpush.msra.mxu1 %v82_v4  ;;  %vm25_vm1 = vcmask 130048  }
   0x6   :  { %156 = vmatpush.msra.mxu3 %v31_v2  ;;  %59 = vmatpush.msra.mxu0 %v31_v2  ;;  %v81_v8 = vld [vmem:[%s292_s3 + $0x28] sm:$0xff]  ;;  %v80_v9 = vld [vmem:[%s292_s3 + $0x20] sm:$0xff]  ;;  %v79_v10 = vld [vmem:[%s292_s3 + $0x18] sm:$0xff]  ;;  %v198_v14 = vmov 0.0   ;;  %vm84_vm3 = vcmask 523264   ;;  %s199_s21 = smov [#allocation3]  }
   0x7   :  { %160 = vmatpush.msra.mxu2 %v81_v8  ;;  %101 = vmatpush.msra.mxu1 %v81_v8  ;;  %v78_v11 = vld [vmem:[%s292_s3 + $0x10] sm:$0xff]  ;;  %v77_v12 = vld [vmem:[%s292_s3 + $0x8] sm:$0xff]  ;;  %v76_v13 = vld [vmem:[%s292_s3] sm:$0xff]  ;;  %26 = vst.msk [vmem:[#allocation2] sm:$0xff] %vm25_vm1, %v198_v14  ;;  %s136_s22 = sshll.u32 %s199_s21, 4  ;;  %s138_s25 = sshll.u32 %s294_s5, 4  ;;  %s137_s22 = int_to_ptr.vmem [resolvable:$true] %s136_s22  ;;  %s139_s25 = int_to_ptr.hbm [resolvable:$true] %s138_s25 }
   0x8   :  { %157 = vmatpush.msra.mxu3 %v30_v5  ;;  %60 = vmatpush.msra.mxu0 %v30_v5  ;;  %27 = vst.msk [vmem:[#allocation2 + $0x8] sm:$0xff] %vm25_vm1, %v198_v14  ;;  %v170_v15 = vld [vmem:[%s291_s2] ss:$0 sm:$0xff]  ;;  %s201_s26 = smov 8  }
   0x9   :  { %151 = vmatmul.msk.f32.vlgmr.msra.gmra.mxu3 %vm38_vm0, %v29_v6  ;;  %150 = vmatmul.msk.f32.vlgmr.msra.gmra.mxu0 %vm38_vm0, %v28_v7  ;;  %v171_v27 = vld [vmem:[%s293_s4] ss:$0 sm:$0xff]  ;;  %s200_s4 = smov 128  }
   0xa   :  { %161 = vmatpush.msra.mxu2 %v80_v9  ;;  %102 = vmatpush.msra.mxu1 %v80_v9 }
   0xc   :  { %162 = vmatpush.msra.mxu2 %v79_v10  ;;  %103 = vmatpush.msra.mxu1 %v79_v10 }
   0xe   :  { %163 = vmatpush.msra.mxu2 %v78_v11  ;;  %104 = vmatpush.msra.mxu1 %v78_v11  ;;  %v74_v24 = vld [vmem:[#allocation2] sm:$0xff] }
   0xf   :  { %v75_v28 = vld [vmem:[#allocation2 + $0x8] sm:$0xff] }
  0x10   :  { %164 = vmatpush.msra.mxu2 %v77_v12  ;;  %105 = vmatpush.msra.mxu1 %v77_v12 }
  0x12   :  { %165 = vmatpush.msra.mxu2 %v76_v13  ;;  %106 = vmatpush.msra.mxu1 %v76_v13 }
  0x86   :  { %v62_v16 = vpop.f32.mrf.mxu0 }
  0x87   :  { %v63_v17 = vadd.f32 %v170_v15, %v62_v16 }
  0x89   :  { %v70_v18 = vmul.f32 0.1, %v63_v17  ;;  %vm68_vm2 = vcmp.gt.f32.partialorder %v63_v17, 0.0 }
  0x8b   :  { %v72_v19 = vsel %vm68_vm2, %v63_v17, %v70_v18 }
  0x8c   :  { %v65_v20 = vpop.f32.mrf.mxu3  ;;  %152 = vmatmul.msk.f32.vlgmr.msra.gmra.mxu1 %vm84_vm3, %v72_v19 }
  0x8d   :  { %v66_v21 = vadd.f32 %v170_v15, %v65_v20 }
  0x8f   :  { %v71_v22 = vmul.f32 0.1, %v66_v21  ;;  %vm69_vm4 = vcmp.gt.f32.partialorder %v66_v21, 0.0 }
  0x91   :  { %v73_v23 = vsel %vm69_vm4, %v66_v21, %v71_v22 }
  0x92   :  { %153 = vmatmul.msk.f32.vlgmr.msra.gmra.mxu2 %vm84_vm3, %v73_v23 }
 0x109   :  { %v108_v25 = vpop.f32.mrf.mxu1 }
 0x10a   :  { %v114_v26 = vadd.f32 %v108_v25, %v74_v24 }
 0x10c   :  { %117 = vst.msk [vmem:[#allocation2] sm:$0xff] %vm25_vm1, %v114_v26 }
 0x113   :  { %v122_v29 = vld [vmem:[#allocation2] sm:$0xff] }
 0x114   :  { %v128_v30 = vadd.f32 %v171_v27, %v122_v29 }
 0x115   :  { %v111_v31 = vpop.f32.mrf.mxu2 }
 0x116   :  { %v115_v32 = vadd.f32 %v111_v31, %v75_v28  ;;  %130 = vst.msk [vmem:[#allocation3] sm:$0xff] %vm25_vm1, %v128_v30 }
 0x118   :  { %118 = vst.msk [vmem:[#allocation2 + $0x8] sm:$0xff] %vm25_vm1, %v115_v32 }
 0x11f   :  { %v123_v33 = vld [vmem:[#allocation2 + $0x8] sm:$0xff] }
 0x120   :  { %v129_v34 = vadd.f32 %v171_v27, %v123_v33 }
 0x122   :  { %131 = vst.msk [vmem:[#allocation3 + $0x8] sm:$0xff] %vm25_vm1, %v129_v34 }
 0x123   :  { %144 = dma.vmem_to_hbm [thread:$0]  %s137_s22, 256, %s139_s25, [#allocation4], %s200_s4, %s200_s4, %s201_s26  }
 0x124   :  { %196 = dma.done.wait [#allocation4], 256  }
 0x125   :  { %197 = vsyncadd [#allocation4], 4294967040 }
 0x126   :  { %149 = vsyncpa [#allocation4], 1 }

</bundles_post_ra>
